<compile_context>
chip_gen: v7x
topology: tpu7x:2x2x1
jax: 0.10.0
libtpu: 0.0.40
codegen_flags: <defaults>
</compile_context>

<pallas_src>
import math
from functools import partial

import numpy as np
import jax
import jax.numpy as jnp
from jax.experimental import pallas as pl
from jax.experimental.pallas import tpu as pltpu


def _dft_matrices(H, W, Wfp):
    """Float64 DFT matrices implementing rfft2/irfft2 with norm='ortho'.

    Returns (all padded along the rfft-frequency axis to Wfp):
      ArT, AiT : (W, Wfp)   forward rfft along W   (x @ (ArT + i AiT))
      Br,  Bi  : (H, H)     forward full DFT along H ((Br + i Bi) @ x)
      DrT, DsT : (Wfp, W)   inverse rfft along W with Hermitian weights c_k
                            (real projection deferred to the H-inverse)
    """
    Wf = W // 2 + 1
    kw = np.arange(Wf, dtype=np.float64)[:, None]
    wn = np.arange(W, dtype=np.float64)[None, :]
    ang_w = 2.0 * np.pi * kw * wn / W            # (Wf, W)
    sW = np.sqrt(W)

    ArT = np.zeros((W, Wfp), dtype=np.float64)
    AiT = np.zeros((W, Wfp), dtype=np.float64)
    ArT[:, :Wf] = (np.cos(ang_w) / sW).T
    AiT[:, :Wf] = (-np.sin(ang_w) / sW).T

    kh = np.arange(H, dtype=np.float64)[:, None]
    hn = np.arange(H, dtype=np.float64)[None, :]
    ang_h = 2.0 * np.pi * kh * hn / H            # (H, H)
    sH = np.sqrt(H)
    Br = np.cos(ang_h) / sH
    Bi = -np.sin(ang_h) / sH

    # Hermitian-extension coefficients: c_0 = 1, c_{W/2} = 1 (W even), else 2.
    # (sin rows are identically zero at DC/Nyquist -> pocketfft c2r behaviour of
    #  dropping those imaginary parts is reproduced automatically.)
    c = np.full((Wf,), 2.0)
    c[0] = 1.0
    if W % 2 == 0:
        c[Wf - 1] = 1.0
    DrT = np.zeros((Wfp, W), dtype=np.float64)
    DsT = np.zeros((Wfp, W), dtype=np.float64)
    DrT[:Wf] = (c[:, None] * np.cos(ang_w)) / sW
    DsT[:Wf] = (c[:, None] * np.sin(ang_w)) / sW
    return ArT, AiT, Br, Bi, DrT, DsT


def _ffparser_kernel(x_ref, hf_ref, hi_ref, a_ref, d_ref, wr_ref, wi_ref, o_ref):
    f32 = jnp.float32
    bf16 = jnp.bfloat16

    R, F = wr_ref.shape          # R = (batches-per-step)*H rows, F = T*Wfp lanes
    TW = x_ref.shape[-1]

    x = x_ref[...]                                                   # (R, TW) f32

    # stage 1 — fused forward full DFT along H: [pr; pi] = [Br; Bi](blk) @ x
    p = jnp.dot(hf_ref[...], x, preferred_element_type=f32)          # (2R, TW)

    # stage 2 — fused forward rfft along W: [pr; pi] @ [Ar | Ai]  (block-diag kron)
    r = jnp.dot(p.astype(bf16), a_ref[...],
                preferred_element_type=f32)                          # (2R, 2F)
    xr = r[:R, :F] - r[R:, F:]                                       # Re[rfft2(x)]
    xi = r[:R, F:] + r[R:, :F]                                       # Im[rfft2(x)]

    # element-wise complex multiply with the learned weight (f32)
    wr = wr_ref[...]
    wi = wi_ref[...]
    zr = xr * wr - xi * wi
    zi = xr * wi + xi * wr

    # stage 3 — fused inverse rfft along W: [zr; zi] @ [Dr | Ds]
    z = jnp.concatenate([zr, zi], axis=0).astype(bf16)               # (2R, F)
    s = jnp.dot(z, d_ref[...], preferred_element_type=f32)           # (2R, 2TW)
    vr = s[:R, :TW] - s[R:, TW:]
    vi = s[:R, TW:] + s[R:, :TW]

    # stage 4 — fused inverse DFT along H + real projection: [Br | Bi](blk) @ [vr; vi]
    v = jnp.concatenate([vr, vi], axis=0)                            # (2R, TW) f32
    o_ref[...] = jnp.dot(hi_ref[...], v, preferred_element_type=f32)  # (R, TW)


def _num_parallel_cores():
    """Grid steps that 'parallel' dimension_semantics can shard across."""
    try:
        kind = jax.devices()[0].device_kind.lower()
    except Exception:
        return 1
    # v7x has 2 TensorCores per chip; v4/v5p megacore also shards parallel axes.
    if any(tag in kind for tag in ("v7", "7x", "v4")):
        return 2
    return 1


@partial(jax.jit, static_argnums=(2,))
def _ffparser_impl(x, complex_weight, bb):
    B, C, D, H, W = x.shape
    assert H == W, "height and width are not equal"
    Wf = W // 2 + 1
    T = C * D
    TW = T * W
    # Pad the per-block rfft width so T*Wfp is a 128-lane multiple (9 -> 16 here).
    step = 128 // math.gcd(T, 128)
    Wfp = ((Wf + step - 1) // step) * step
    F = T * Wfp
    G = B // bb                 # grid steps
    R = bb * H                  # LHS rows per step

    # ---------------- trace-time constants (float64 -> one cast) ----------------
    ArT, AiT, Br, Bi, DrT, DsT = _dft_matrices(H, W, Wfp)
    eye_t = np.eye(T)
    a_cat = np.concatenate([np.kron(eye_t, ArT), np.kron(eye_t, AiT)], axis=1)  # (TW, 2F)
    d_cat = np.concatenate([np.kron(eye_t, DrT), np.kron(eye_t, DsT)], axis=1)  # (F, 2TW)
    a_cat = jnp.asarray(a_cat, dtype=jnp.bfloat16)
    d_cat = jnp.asarray(d_cat, dtype=jnp.bfloat16)

    eye_b = np.eye(bb)
    hf = np.concatenate([np.kron(eye_b, Br), np.kron(eye_b, Bi)], axis=0)       # (2R, R)
    hi = np.concatenate([np.kron(eye_b, Br), np.kron(eye_b, Bi)], axis=1)       # (R, 2R)
    hf = jnp.asarray(hf, dtype=jnp.float32)      # tiny: keep f32 for accuracy
    hi = jnp.asarray(hi, dtype=jnp.float32)

    # ------------- wrapper-side layout plumbing (lane-dense slabs) -------------
    # x: (B,C,D,H,W) -> (B,H,C,D,W) -> (G, bb*H, T*W)
    x2 = jnp.transpose(x.astype(jnp.float32), (0, 3, 1, 2, 4)).reshape(B, H, TW)
    x2 = x2.reshape(G, R, TW)

    # weight: (C,D,Hf,Wf) real/imag -> (H, C, D, Wfp) -> (bb*H, T*Wfp), f32
    def prep_w(w):
        w = jnp.transpose(w, (2, 0, 1, 3))                       # (H, C, D, Wf)
        w = jnp.pad(w, ((0, 0), (0, 0), (0, 0), (0, Wfp - Wf)))
        w = w.reshape(H, F)
        return jnp.tile(w, (bb, 1))                              # (R, F)

    wr2 = prep_w(complex_weight[..., 0].astype(jnp.float32))
    wi2 = prep_w(complex_weight[..., 1].astype(jnp.float32))

    def const_spec(shape):
        return pl.BlockSpec(shape, lambda g: (0, 0))

    out2 = pl.pallas_call(
        _ffparser_kernel,
        out_shape=jax.ShapeDtypeStruct((G, R, TW), jnp.float32),
        grid=(G,),
        in_specs=[
            pl.BlockSpec((None, R, TW), lambda g: (g, 0, 0)),    # x slab
            const_spec((2 * R, R)),                              # [Br; Bi] (blk-diag over bb)
            const_spec((R, 2 * R)),                              # [Br | Bi]
            const_spec((TW, 2 * F)),                             # [kron(I,Ar) | kron(I,Ai)]
            const_spec((F, 2 * TW)),                             # [kron(I,Dr) | kron(I,Ds)]
            const_spec((R, F)),                                  # weight re
            const_spec((R, F)),                                  # weight im
        ],
        out_specs=pl.BlockSpec((None, R, TW), lambda g: (g, 0, 0)),
        compiler_params=pltpu.CompilerParams(
            dimension_semantics=("parallel",),
            vmem_limit_bytes=32 * 1024 * 1024),
    )(x2, hf, hi, a_cat, d_cat, wr2, wi2)

    # (G, bb*H, T*W) -> (B, C, D, H, W)
    # TODO(synk): at realistic shapes keep the (B, H, C*D*W) layout end-to-end to
    # avoid these extra HBM transpose passes.
    out = out2.reshape(B, H, C, D, W).transpose(0, 2, 3, 1, 4)
    return out


def ffparser_forward(x, complex_weight):
    """x: (B, C, D, H, W) f32. complex_weight: (C, D, W, H//2+1, 2) f32 (H == W)."""
    B = x.shape[0]
    n_tc = _num_parallel_cores()
    if n_tc > 1 and B % n_tc == 0:
        bb = B // n_tc          # keep n_tc parallel grid steps (v7x: one per core)
    else:
        bb = B                  # single TensorCore: fold whole batch into M
    return _ffparser_impl(x, complex_weight, bb)


if __name__ == "__main__":
    B, C, D, H, W = 2, 4, 4, 16, 16
    key = jax.random.PRNGKey(0)
    kx, kw = jax.random.split(key)
    x = jax.random.normal(kx, (B, C, D, H, W), dtype=jnp.float32)
    # nn.Parameter(torch.randn(dim, d, w, h//2+1, 2) * 0.02), deterministic init here
    complex_weight = 0.02 * jax.random.normal(
        kw, (C, D, W, H // 2 + 1, 2), dtype=jnp.float32)

    out = jax.block_until_ready(ffparser_forward(x, complex_weight))

    # Reference: same semantics as the PyTorch forward, via jnp.fft
    w_c = complex_weight[..., 0] + 1j * complex_weight[..., 1]
    xf = jnp.fft.rfft2(x, axes=(3, 4), norm="ortho")
    ref = jnp.fft.irfft2(xf * w_c, s=(H, W), axes=(3, 4), norm="ortho")
    np.testing.assert_allclose(np.asarray(out), np.asarray(ref),
                               atol=5e-3, rtol=5e-2)
    print("KERNEL_OK")
</pallas_src>

<mosaic_0001>
module attributes {stable_mosaic.version = 11 : i64} {
  func.func @_ffparser_kernel(%arg0: i32, %arg1: memref<1x32x256xf32, #tpu.memory_space<vmem>>, %arg2: memref<64x32xf32, #tpu.memory_space<vmem>>, %arg3: memref<32x64xf32, #tpu.memory_space<vmem>>, %arg4: memref<256x512xbf16, #tpu.memory_space<vmem>>, %arg5: memref<256x512xbf16, #tpu.memory_space<vmem>>, %arg6: memref<32x256xf32, #tpu.memory_space<vmem>>, %arg7: memref<32x256xf32, #tpu.memory_space<vmem>>, %arg8: memref<1x32x256xf32, #tpu.memory_space<vmem>>) attributes {dimension_semantics = [#tpu.dimension_semantics<parallel>], iteration_bounds = array<i64: 1>, scalar_prefetch = 0 : i64, scratch_operands = 0 : i64, tpu.core_type = #tpu.core_type<tc>, window_params = [{transform_indices = @transform_0, window_bounds = array<i64: 1, 32, 256>}, {pipeline_mode = #tpu.pipeline_mode<synchronous>, transform_indices = @transform_1, window_bounds = array<i64: 64, 32>}, {pipeline_mode = #tpu.pipeline_mode<synchronous>, transform_indices = @transform_2, window_bounds = array<i64: 32, 64>}, {pipeline_mode = #tpu.pipeline_mode<synchronous>, transform_indices = @transform_3, window_bounds = array<i64: 256, 512>}, {pipeline_mode = #tpu.pipeline_mode<synchronous>, transform_indices = @transform_4, window_bounds = array<i64: 256, 512>}, {pipeline_mode = #tpu.pipeline_mode<synchronous>, transform_indices = @transform_5, window_bounds = array<i64: 32, 256>}, {pipeline_mode = #tpu.pipeline_mode<synchronous>, transform_indices = @transform_6, window_bounds = array<i64: 32, 256>}, {transform_indices = @transform_7, window_bounds = array<i64: 1, 32, 256>}]} {
    %c0 = arith.constant 0 : index
    %c0_0 = arith.constant 0 : index
    %c0_1 = arith.constant 0 : index
    %0 = vector.load %arg1[%c0, %c0_0, %c0_1] : memref<1x32x256xf32, #tpu.memory_space<vmem>>, vector<1x32x256xf32>
    %1 = vector.shape_cast %0 : vector<1x32x256xf32> to vector<32x256xf32>
    %c0_2 = arith.constant 0 : index
    %c0_3 = arith.constant 0 : index
    %2 = vector.load %arg2[%c0_2, %c0_3] : memref<64x32xf32, #tpu.memory_space<vmem>>, vector<64x32xf32>
    %cst = arith.constant dense<0.000000e+00> : vector<64x256xf32>
    %3 = tpu.matmul %2, %1, %cst {dimension_numbers = #tpu.dot_dimension_numbers<[1], [0], [0], [1], [0, 0, 1, 1], [], []>} : vector<64x32xf32>, vector<32x256xf32>, vector<64x256xf32> -> vector<64x256xf32>
    %4 = arith.truncf %3 : vector<64x256xf32> to vector<64x256xbf16>
    %c0_4 = arith.constant 0 : index
    %c0_5 = arith.constant 0 : index
    %5 = vector.load %arg4[%c0_4, %c0_5] : memref<256x512xbf16, #tpu.memory_space<vmem>>, vector<256x512xbf16>
    %cst_6 = arith.constant dense<0.000000e+00> : vector<64x512xf32>
    %6 = tpu.matmul %4, %5, %cst_6 {dimension_numbers = #tpu.dot_dimension_numbers<[1], [0], [0], [1], [0, 0, 1, 1], [], []>} : vector<64x256xbf16>, vector<256x512xbf16>, vector<64x512xf32> -> vector<64x512xf32>
    %7 = vector.extract_strided_slice %6 {offsets = [0, 0], sizes = [32, 256], strides = [1, 1]} : vector<64x512xf32> to vector<32x256xf32>
    %8 = vector.extract_strided_slice %6 {offsets = [32, 256], sizes = [32, 256], strides = [1, 1]} : vector<64x512xf32> to vector<32x256xf32>
    %9 = arith.subf %7, %8 : vector<32x256xf32>
    %10 = vector.extract_strided_slice %6 {offsets = [0, 256], sizes = [32, 256], strides = [1, 1]} : vector<64x512xf32> to vector<32x256xf32>
    %11 = vector.extract_strided_slice %6 {offsets = [32, 0], sizes = [32, 256], strides = [1, 1]} : vector<64x512xf32> to vector<32x256xf32>
    %12 = arith.addf %10, %11 : vector<32x256xf32>
    %c0_7 = arith.constant 0 : index
    %c0_8 = arith.constant 0 : index
    %13 = vector.load %arg6[%c0_7, %c0_8] : memref<32x256xf32, #tpu.memory_space<vmem>>, vector<32x256xf32>
    %c0_9 = arith.constant 0 : index
    %c0_10 = arith.constant 0 : index
    %14 = vector.load %arg7[%c0_9, %c0_10] : memref<32x256xf32, #tpu.memory_space<vmem>>, vector<32x256xf32>
    %15 = arith.mulf %9, %13 : vector<32x256xf32>
    %16 = arith.mulf %12, %14 : vector<32x256xf32>
    %17 = arith.subf %15, %16 : vector<32x256xf32>
    %18 = arith.mulf %9, %14 : vector<32x256xf32>
    %19 = arith.mulf %12, %13 : vector<32x256xf32>
    %20 = arith.addf %18, %19 : vector<32x256xf32>
    %21 = tpu.concatenate %17, %20 in 0 : vector<32x256xf32>, vector<32x256xf32> -> vector<64x256xf32>
    %22 = arith.truncf %21 : vector<64x256xf32> to vector<64x256xbf16>
    %c0_11 = arith.constant 0 : index
    %c0_12 = arith.constant 0 : index
    %23 = vector.load %arg5[%c0_11, %c0_12] : memref<256x512xbf16, #tpu.memory_space<vmem>>, vector<256x512xbf16>
    %cst_13 = arith.constant dense<0.000000e+00> : vector<64x512xf32>
    %24 = tpu.matmul %22, %23, %cst_13 {dimension_numbers = #tpu.dot_dimension_numbers<[1], [0], [0], [1], [0, 0, 1, 1], [], []>} : vector<64x256xbf16>, vector<256x512xbf16>, vector<64x512xf32> -> vector<64x512xf32>
    %25 = vector.extract_strided_slice %24 {offsets = [0, 0], sizes = [32, 256], strides = [1, 1]} : vector<64x512xf32> to vector<32x256xf32>
    %26 = vector.extract_strided_slice %24 {offsets = [32, 256], sizes = [32, 256], strides = [1, 1]} : vector<64x512xf32> to vector<32x256xf32>
    %27 = arith.subf %25, %26 : vector<32x256xf32>
    %28 = vector.extract_strided_slice %24 {offsets = [0, 256], sizes = [32, 256], strides = [1, 1]} : vector<64x512xf32> to vector<32x256xf32>
    %29 = vector.extract_strided_slice %24 {offsets = [32, 0], sizes = [32, 256], strides = [1, 1]} : vector<64x512xf32> to vector<32x256xf32>
    %30 = arith.addf %28, %29 : vector<32x256xf32>
    %31 = tpu.concatenate %27, %30 in 0 : vector<32x256xf32>, vector<32x256xf32> -> vector<64x256xf32>
    %c0_14 = arith.constant 0 : index
    %c0_15 = arith.constant 0 : index
    %32 = vector.load %arg3[%c0_14, %c0_15] : memref<32x64xf32, #tpu.memory_space<vmem>>, vector<32x64xf32>
    %cst_16 = arith.constant dense<0.000000e+00> : vector<32x256xf32>
    %33 = tpu.matmul %32, %31, %cst_16 {dimension_numbers = #tpu.dot_dimension_numbers<[1], [0], [0], [1], [0, 0, 1, 1], [], []>} : vector<32x64xf32>, vector<64x256xf32>, vector<32x256xf32> -> vector<32x256xf32>
    %c0_17 = arith.constant 0 : index
    %c0_18 = arith.constant 0 : index
    %c0_19 = arith.constant 0 : index
    %34 = vector.load %arg8[%c0_17, %c0_18, %c0_19] : memref<1x32x256xf32, #tpu.memory_space<vmem>>, vector<1x32x256xf32>
    %35 = vector.shape_cast %34 : vector<1x32x256xf32> to vector<32x256xf32>
    %36 = vector.shape_cast %33 : vector<32x256xf32> to vector<1x32x256xf32>
    tpu.vector_store %arg8[%c0_17, %c0_18, %c0_19], %36 {strides = array<i32>} : memref<1x32x256xf32, #tpu.memory_space<vmem>>, vector<1x32x256xf32>,
    return
  }
  func.func @transform_0(%arg0: i32) -> (i32, i32, i32) {
    %c0_i32 = arith.constant 0 : i32
    %c0_i32_0 = arith.constant 0 : i32
    %c0_i32_1 = arith.constant 0 : i32
    return %arg0, %c0_i32, %c0_i32_0 : i32, i32, i32
  }
  func.func @transform_1(%arg0: i32) -> (i32, i32) {
    %c0_i32 = arith.constant 0 : i32
    %c0_i32_0 = arith.constant 0 : i32
    %c0_i32_1 = arith.constant 0 : i32
    return %c0_i32, %c0_i32_0 : i32, i32
  }
  func.func @transform_2(%arg0: i32) -> (i32, i32) {
    %c0_i32 = arith.constant 0 : i32
    %c0_i32_0 = arith.constant 0 : i32
    %c0_i32_1 = arith.constant 0 : i32
    return %c0_i32, %c0_i32_0 : i32, i32
  }
  func.func @transform_3(%arg0: i32) -> (i32, i32) {
    %c0_i32 = arith.constant 0 : i32
    %c0_i32_0 = arith.constant 0 : i32
    %c0_i32_1 = arith.constant 0 : i32
    return %c0_i32, %c0_i32_0 : i32, i32
  }
  func.func @transform_4(%arg0: i32) -> (i32, i32) {
    %c0_i32 = arith.constant 0 : i32
    %c0_i32_0 = arith.constant 0 : i32
    %c0_i32_1 = arith.constant 0 : i32
    return %c0_i32, %c0_i32_0 : i32, i32
  }
  func.func @transform_5(%arg0: i32) -> (i32, i32) {
    %c0_i32 = arith.constant 0 : i32
    %c0_i32_0 = arith.constant 0 : i32
    %c0_i32_1 = arith.constant 0 : i32
    return %c0_i32, %c0_i32_0 : i32, i32
  }
  func.func @transform_6(%arg0: i32) -> (i32, i32) {
    %c0_i32 = arith.constant 0 : i32
    %c0_i32_0 = arith.constant 0 : i32
    %c0_i32_1 = arith.constant 0 : i32
    return %c0_i32, %c0_i32_0 : i32, i32
  }
  func.func @transform_7(%arg0: i32) -> (i32, i32, i32) {
    %c0_i32 = arith.constant 0 : i32
    %c0_i32_0 = arith.constant 0 : i32
    %c0_i32_1 = arith.constant 0 : i32
    return %arg0, %c0_i32, %c0_i32_0 : i32, i32, i32
  }
}

</mosaic_0001>

<bundles_post_ra>
// kernel: _ffparser_impl.1
= control target key start
LH: loop header
LB: loop body
LE: loop exit
PB: predicated region body
PF: predicated region fallthrough
CT: control target
= control target key end

     0   :  { %v1851_v3 = vmov 0.0   ;;  %vm42_vm0 = vcmask 261120   ;;  %vm1356_vm1 = vcmask 523264   ;;  %s2488_s0 = inlined_call_operand.vmem [shape: f32[1,32,256], index: 0, kind: input, shape index: {}]   ;;  %s2489_s3 = inlined_call_operand.vmem [shape: bf16[256,512], index: 3, kind: input, shape index: {}]   ;;  %s2490_s1 = inlined_call_operand.vmem [shape: f32[64,32], index: 1, kind: input, shape index: {}]   ;;  %s2491_s4 = inlined_call_operand.vmem [shape: bf16[256,512], index: 4, kind: input, shape index: {}]   ;;  %s2492_s5 = inlined_call_operand.vmem [shape: f32[32,256], index: 5, kind: input, shape index: {}]   ;;  %s2493_s6 = inlined_call_operand.vmem [shape: f32[32,256], index: 6, kind: input, shape index: {}]   ;;  %s2494_s2 = inlined_call_operand.vmem [shape: f32[32,64], index: 2, kind: input, shape index: {}]   ;;  %s2495_s7 = inlined_call_operand.vmem [shape: f32[1,32,256], index: 7, kind: output, shape index: {}]  }
   0x1   :  { %v27_v0 = vld [vmem:[%s2488_s0 + $0x8] sm:$0xff]  ;;  %v29_v1 = vld [vmem:[%s2488_s0 + $0x18] sm:$0xff]  ;;  %v26_v2 = vld [vmem:[%s2488_s0] sm:$0xff]  ;;  %131 = vmatprep.mubr.f32.mxu0 %v1851_v3 }
   0x2   :  { %v1610_v4 = vpack.c.bf16 %v29_v1, %v27_v0  ;;  %v28_v5 = vld [vmem:[%s2488_s0 + $0x10] sm:$0xff]  ;;  %v31_v6 = vld [vmem:[%s2488_s0 + $0x28] sm:$0xff]  ;;  %v33_v7 = vld [vmem:[%s2488_s0 + $0x38] sm:$0xff] }
   0x3   :  { %v1612_v8 = vpack.c.bf16 %v28_v5, %v26_v2  ;;  %v1614_v9 = vpack.c.bf16 %v33_v7, %v31_v6  ;;  %v30_v10 = vld [vmem:[%s2488_s0 + $0x20] sm:$0xff]  ;;  %v32_v11 = vld [vmem:[%s2488_s0 + $0x30] sm:$0xff]  ;;  %v35_v19 = vld [vmem:[%s2490_s1 + $0x8] sm:$0xff] }
   0x4   :  { %1611 = vmatprep.subr.bf16.mxu0 %v1610_v4  ;;  %v1616_v12 = vpack.c.bf16 %v32_v11, %v30_v10  ;;  %v1659_v13 = vld [vmem:[%s2489_s3 + $0x4] ss:$16 sps:$4 sm:$0xff]   ;;  %v1661_v14 = vld [vmem:[%s2489_s3] ss:$16 sps:$4 sm:$0xff]   ;;  %v37_v25 = vld [vmem:[%s2490_s1 + $0x18] sm:$0xff] }
   0x5   :  { %1613 = vmatpush1.bf16.msra.mxu0 %v1612_v8  ;;  %v1662_v15 = vld [vmem:[%s2489_s3 + $0x24] ss:$16 sps:$4 sm:$0xff]   ;;  %572 = vmatprep.subr.bf16.mxu1 %v1659_v13  ;;  %v1664_v17 = vld [vmem:[%s2489_s3 + $0x20] ss:$16 sps:$4 sm:$0xff]   ;;  %v39_v31 = vld [vmem:[%s2490_s1 + $0x28] sm:$0xff] }
   0x6   :  { %1615 = vmatprep.subr.bf16.mxu0 %v1614_v9  ;;  %v34_v16 = vld [vmem:[%s2490_s1] sm:$0xff]  ;;  %573 = vmatpush1.bf16.msra.mxu1 %v1661_v14  ;;  %v36_v22 = vld [vmem:[%s2490_s1 + $0x10] sm:$0xff]  ;;  %v41_v37 = vld [vmem:[%s2490_s1 + $0x38] sm:$0xff] }
   0x7   :  { %574 = vmatprep.subr.bf16.mxu1 %v1662_v15  ;;  %v1665_v18 = vld [vmem:[%s2489_s3 + $0x44] ss:$16 sps:$4 sm:$0xff]   ;;  %v1667_v20 = vld [vmem:[%s2489_s3 + $0x40] ss:$16 sps:$4 sm:$0xff]   ;;  %v1709_v53 = vld [vmem:[%s2489_s3 + $0xc] ss:$16 sps:$4 sm:$0xff]  }
   0x8   :  { %v1668_v21 = vld [vmem:[%s2489_s3 + $0x64] ss:$16 sps:$4 sm:$0xff]   ;;  %v1670_v23 = vld [vmem:[%s2489_s3 + $0x60] ss:$16 sps:$4 sm:$0xff]   ;;  %v1707_v60 = vld [vmem:[%s2489_s3 + $0x8] ss:$16 sps:$4 sm:$0xff]  }
   0x9   :  { %1617 = vmatpush1.bf16.msra.mxu0 %v1616_v12  ;;  %v1671_v24 = vld [vmem:[%s2489_s3 + $0x84] ss:$16 sps:$4 sm:$0xff]   ;;  %v1673_v26 = vld [vmem:[%s2489_s3 + $0x80] ss:$16 sps:$4 sm:$0xff]   ;;  %v1712_v61 = vld [vmem:[%s2489_s3 + $0x2c] ss:$16 sps:$4 sm:$0xff]  }
   0xa   :  { %575 = vmatpush1.bf16.msra.mxu1 %v1664_v17  ;;  %v1674_v27 = vld [vmem:[%s2489_s3 + $0xa4] ss:$16 sps:$4 sm:$0xff]   ;;  %v1676_v29 = vld [vmem:[%s2489_s3 + $0xa0] ss:$16 sps:$4 sm:$0xff]   ;;  %v1710_v0 = vld [vmem:[%s2489_s3 + $0x28] ss:$16 sps:$4 sm:$0xff]  }
   0xb   :  { %576 = vmatprep.subr.bf16.mxu1 %v1665_v18  ;;  %v38_v28 = vld [vmem:[%s2490_s1 + $0x20] sm:$0xff]  ;;  %v40_v34 = vld [vmem:[%s2490_s1 + $0x30] sm:$0xff]  ;;  %v1715_v1 = vld [vmem:[%s2489_s3 + $0x4c] ss:$16 sps:$4 sm:$0xff]  }
   0xc   :  { %1470 = vmatmul.mubr.msk.f32.vlgmr.msra.gmra.mrb[0].mxu0 %vm42_vm0, %v34_v16  ;;  %v1677_v30 = vld [vmem:[%s2489_s3 + $0xc4] ss:$16 sps:$4 sm:$0xff]   ;;  %v1679_v32 = vld [vmem:[%s2489_s3 + $0xc0] ss:$16 sps:$4 sm:$0xff]   ;;  %v1713_v7 = vld [vmem:[%s2489_s3 + $0x48] ss:$16 sps:$4 sm:$0xff]  }
   0xd   :  { %137 = vmatprep.mubr.f32.mxu0 %v1851_v3  ;;  %v1680_v33 = vld [vmem:[%s2489_s3 + $0xe4] ss:$16 sps:$4 sm:$0xff]   ;;  %v1682_v35 = vld [vmem:[%s2489_s3 + $0xe0] ss:$16 sps:$4 sm:$0xff]   ;;  %v1718_v8 = vld [vmem:[%s2489_s3 + $0x6c] ss:$16 sps:$4 sm:$0xff]  }
   0xe   :  { %577 = vmatpush1.bf16.msra.mxu1 %v1667_v20  ;;  %v1683_v36 = vld [vmem:[%s2489_s3 + $0x104] ss:$16 sps:$4 sm:$0xff]   ;;  %v1685_v38 = vld [vmem:[%s2489_s3 + $0x100] ss:$16 sps:$4 sm:$0xff]   ;;  %v1716_v11 = vld [vmem:[%s2489_s3 + $0x68] ss:$16 sps:$4 sm:$0xff]  }
   0xf   :  { %578 = vmatprep.subr.bf16.mxu1 %v1668_v21  ;;  %v1686_v39 = vld [vmem:[%s2489_s3 + $0x124] ss:$16 sps:$4 sm:$0xff]   ;;  %v1688_v40 = vld [vmem:[%s2489_s3 + $0x120] ss:$16 sps:$4 sm:$0xff]   ;;  %v1721_v12 = vld [vmem:[%s2489_s3 + $0x8c] ss:$16 sps:$4 sm:$0xff]  }
  0x10   :  { %1471 = vmatmul.mubr.msk.f32.gmra.mrb[2].mxu0 %vm42_vm0, %v35_v19  ;;  %v1689_v41 = vld [vmem:[%s2489_s3 + $0x144] ss:$16 sps:$4 sm:$0xff]   ;;  %v1691_v42 = vld [vmem:[%s2489_s3 + $0x140] ss:$16 sps:$4 sm:$0xff]   ;;  %v1719_v17 = vld [vmem:[%s2489_s3 + $0x88] ss:$16 sps:$4 sm:$0xff]  }
  0x11   :  { %143 = vmatprep.mubr.f32.mxu0 %v1851_v3  ;;  %v1692_v43 = vld [vmem:[%s2489_s3 + $0x164] ss:$16 sps:$4 sm:$0xff]   ;;  %v1694_v44 = vld [vmem:[%s2489_s3 + $0x160] ss:$16 sps:$4 sm:$0xff]   ;;  %v1724_v18 = vld [vmem:[%s2489_s3 + $0xac] ss:$16 sps:$4 sm:$0xff]  }
  0x12   :  { %579 = vmatpush1.bf16.msra.mxu1 %v1670_v23  ;;  %v1695_v45 = vld [vmem:[%s2489_s3 + $0x184] ss:$16 sps:$4 sm:$0xff]   ;;  %v1697_v46 = vld [vmem:[%s2489_s3 + $0x180] ss:$16 sps:$4 sm:$0xff]   ;;  %v1722_v21 = vld [vmem:[%s2489_s3 + $0xa8] ss:$16 sps:$4 sm:$0xff]  }
  0x13   :  { %580 = vmatprep.subr.bf16.mxu1 %v1671_v24  ;;  %v1698_v47 = vld [vmem:[%s2489_s3 + $0x1a4] ss:$16 sps:$4 sm:$0xff]   ;;  %v1700_v48 = vld [vmem:[%s2489_s3 + $0x1a0] ss:$16 sps:$4 sm:$0xff]  }
  0x14   :  { %1472 = vmatmul.mubr.msk.f32.gmra.mrb[4].mxu0 %vm42_vm0, %v36_v22  ;;  %v1701_v49 = vld [vmem:[%s2489_s3 + $0x1c4] ss:$16 sps:$4 sm:$0xff]   ;;  %v1703_v50 = vld [vmem:[%s2489_s3 + $0x1c0] ss:$16 sps:$4 sm:$0xff]   ;;  %v1727_v22 = vld [vmem:[%s2489_s3 + $0xcc] ss:$16 sps:$4 sm:$0xff]  }
  0x15   :  { %149 = vmatprep.mubr.f32.mxu0 %v1851_v3  ;;  %v1704_v51 = vld [vmem:[%s2489_s3 + $0x1e4] ss:$16 sps:$4 sm:$0xff]   ;;  %v1706_v52 = vld [vmem:[%s2489_s3 + $0x1e0] ss:$16 sps:$4 sm:$0xff]  }
  0x16   :  { %581 = vmatpush1.bf16.msra.mxu1 %v1673_v26 }
  0x17   :  { %582 = vmatprep.subr.bf16.mxu1 %v1674_v27  ;;  %v1725_v27 = vld [vmem:[%s2489_s3 + $0xc8] ss:$16 sps:$4 sm:$0xff]  }
  0x18   :  { %1473 = vmatmul.mubr.msk.f32.gmra.mrb[6].mxu0 %vm42_vm0, %v37_v25 }
  0x19   :  { %155 = vmatprep.mubr.f32.mxu0 %v1851_v3 }
  0x1a   :  { %583 = vmatpush1.bf16.msra.mxu1 %v1676_v29  ;;  %v1728_v29 = vld [vmem:[%s2489_s3 + $0xe8] ss:$16 sps:$4 sm:$0xff]  }
  0x1b   :  { %584 = vmatprep.subr.bf16.mxu1 %v1677_v30  ;;  %v1733_v30 = vld [vmem:[%s2489_s3 + $0x10c] ss:$16 sps:$4 sm:$0xff]  }
  0x1c   :  { %1474 = vmatmul.mubr.msk.f32.gmra.mrb[8].mxu0 %vm42_vm0, %v38_v28  ;;  %v1730_v28 = vld [vmem:[%s2489_s3 + $0xec] ss:$16 sps:$4 sm:$0xff]  }
  0x1d   :  { %161 = vmatprep.mubr.f32.mxu0 %v1851_v3 }
  0x1e   :  { %585 = vmatpush1.bf16.msra.mxu1 %v1679_v32  ;;  %v1736_v32 = vld [vmem:[%s2489_s3 + $0x12c] ss:$16 sps:$4 sm:$0xff]  }
  0x1f   :  { %586 = vmatprep.subr.bf16.mxu1 %v1680_v33  ;;  %v1734_v33 = vld [vmem:[%s2489_s3 + $0x128] ss:$16 sps:$4 sm:$0xff]  }
  0x20   :  { %1475 = vmatmul.mubr.msk.f32.gmra.mrb[10].mxu0 %vm42_vm0, %v39_v31  ;;  %v1731_v31 = vld [vmem:[%s2489_s3 + $0x108] ss:$16 sps:$4 sm:$0xff]  }
  0x21   :  { %167 = vmatprep.mubr.f32.mxu0 %v1851_v3 }
  0x22   :  { %587 = vmatpush1.bf16.msra.mxu1 %v1682_v35  ;;  %v1737_v35 = vld [vmem:[%s2489_s3 + $0x148] ss:$16 sps:$4 sm:$0xff]  }
  0x23   :  { %588 = vmatprep.subr.bf16.mxu1 %v1683_v36  ;;  %v1742_v36 = vld [vmem:[%s2489_s3 + $0x16c] ss:$16 sps:$4 sm:$0xff]  }
  0x24   :  { %1476 = vmatmul.mubr.msk.f32.gmra.mrb[12].mxu0 %vm42_vm0, %v40_v34  ;;  %v1739_v34 = vld [vmem:[%s2489_s3 + $0x14c] ss:$16 sps:$4 sm:$0xff]  }
  0x25   :  { %173 = vmatprep.mubr.f32.mxu0 %v1851_v3 }
  0x26   :  { %589 = vmatpush1.bf16.msra.mxu1 %v1685_v38  ;;  %v1745_v38 = vld [vmem:[%s2489_s3 + $0x18c] ss:$16 sps:$4 sm:$0xff]  }
  0x27   :  { %590 = vmatprep.subr.bf16.mxu1 %v1686_v39  ;;  %v1743_v39 = vld [vmem:[%s2489_s3 + $0x188] ss:$16 sps:$4 sm:$0xff]  }
  0x28   :  { %1477 = vmatmul.mubr.msk.f32.gmra.mrb[14].mxu0 %vm42_vm0, %v41_v37  ;;  %v1740_v37 = vld [vmem:[%s2489_s3 + $0x168] ss:$16 sps:$4 sm:$0xff]  }
  0x2a   :  { %591 = vmatpush1.bf16.msra.mxu1 %v1688_v40  ;;  %v1748_v40 = vld [vmem:[%s2489_s3 + $0x1ac] ss:$16 sps:$4 sm:$0xff]  }
  0x2b   :  { %592 = vmatprep.subr.bf16.mxu1 %v1689_v41  ;;  %v1746_v41 = vld [vmem:[%s2489_s3 + $0x1a8] ss:$16 sps:$4 sm:$0xff]  }
  0x2e   :  { %593 = vmatpush1.bf16.msra.mxu1 %v1691_v42  ;;  %v1751_v42 = vld [vmem:[%s2489_s3 + $0x1cc] ss:$16 sps:$4 sm:$0xff]  }
  0x2f   :  { %594 = vmatprep.subr.bf16.mxu1 %v1692_v43  ;;  %v1749_v43 = vld [vmem:[%s2489_s3 + $0x1c8] ss:$16 sps:$4 sm:$0xff]  }
  0x32   :  { %595 = vmatpush1.bf16.msra.mxu1 %v1694_v44  ;;  %v1754_v44 = vld [vmem:[%s2489_s3 + $0x1ec] ss:$16 sps:$4 sm:$0xff]  }
  0x33   :  { %596 = vmatprep.subr.bf16.mxu1 %v1695_v45  ;;  %v1752_v45 = vld [vmem:[%s2489_s3 + $0x1e8] ss:$16 sps:$4 sm:$0xff]  }
  0x36   :  { %597 = vmatpush1.bf16.msra.mxu1 %v1697_v46  ;;  %v1755_v46 = vld [vmem:[%s2491_s4] ss:$16 sps:$4 sm:$0xff]  }
  0x37   :  { %598 = vmatprep.subr.bf16.mxu1 %v1698_v47  ;;  %v1757_v47 = vld [vmem:[%s2491_s4 + $0x4] ss:$16 sps:$4 sm:$0xff]  }
  0x38   :  { %1190 = vmatprep.subr.bf16.mxu0 %v1757_v47 }
  0x39   :  { %1191 = vmatpush1.bf16.msra.mxu0 %v1755_v46 }
  0x3a   :  { %599 = vmatpush1.bf16.msra.mxu1 %v1700_v48  ;;  %v1758_v48 = vld [vmem:[%s2491_s4 + $0x20] ss:$16 sps:$4 sm:$0xff]  }
  0x3b   :  { %600 = vmatprep.subr.bf16.mxu1 %v1701_v49  ;;  %v1760_v49 = vld [vmem:[%s2491_s4 + $0x24] ss:$16 sps:$4 sm:$0xff]  }
  0x3c   :  { %1192 = vmatprep.subr.bf16.mxu0 %v1760_v49 }
  0x3d   :  { %1193 = vmatpush1.bf16.msra.mxu0 %v1758_v48 }
  0x3e   :  { %601 = vmatpush1.bf16.msra.mxu1 %v1703_v50  ;;  %v1763_v50 = vld [vmem:[%s2491_s4 + $0x44] ss:$16 sps:$4 sm:$0xff]  }
  0x3f   :  { %602 = vmatprep.subr.bf16.mxu1 %v1704_v51  ;;  %v1761_v51 = vld [vmem:[%s2491_s4 + $0x40] ss:$16 sps:$4 sm:$0xff]   ;;  %1194 = vmatprep.subr.bf16.mxu0 %v1763_v50 }
  0x41   :  { %1195 = vmatpush1.bf16.msra.mxu0 %v1761_v51 }
  0x42   :  { %603 = vmatpush1.bf16.msra.mxu1 %v1706_v52  ;;  %v1766_v52 = vld [vmem:[%s2491_s4 + $0x64] ss:$16 sps:$4 sm:$0xff]  }
  0x43   :  { %645 = vmatprep.subr.bf16.mxu1 %v1709_v53  ;;  %v1764_v53 = vld [vmem:[%s2491_s4 + $0x60] ss:$16 sps:$4 sm:$0xff]   ;;  %1196 = vmatprep.subr.bf16.mxu0 %v1766_v52 }
  0x45   :  { %1197 = vmatpush1.bf16.msra.mxu0 %v1764_v53 }
  0xdf   :  { %v133_v54 = vpop.f32.mrb[0].mxu0 }
  0xe0   :  { %v135_v55 = vpop.f32.mrb[1].mxu0 }
  0xe3   :  { %v139_v56 = vpop.f32.mrb[2].mxu0 }
  0xe4   :  { %v2055_v57 = vpack.c.bf16 %v139_v56, %v133_v54  ;;  %v141_v58 = vpop.f32.mrb[3].mxu0  ;;  %v1769_v54 = vld [vmem:[%s2491_s4 + $0x84] ss:$16 sps:$4 sm:$0xff]  }
  0xe5   :  { %v181_v59 = vpack.c.bf16 %v141_v58, %v135_v55  ;;  %v1767_v55 = vld [vmem:[%s2491_s4 + $0x80] ss:$16 sps:$4 sm:$0xff]   ;;  %v1772_v56 = vld [vmem:[%s2491_s4 + $0xa4] ss:$16 sps:$4 sm:$0xff]   ;;  %1198 = vmatprep.subr.bf16.mxu0 %v1769_v54 }
  0xe6   :  { %v1775_v58 = vld [vmem:[%s2491_s4 + $0xc4] ss:$16 sps:$4 sm:$0xff]   ;;  %1199 = vmatpush1.bf16.msra.mxu0 %v1767_v55 }
  0xe7   :  { %604 = vmatprep.mubr.bf16.mxu1 %v181_v59  ;;  %v145_v62 = vpop.f32.mrb[4].mxu0  ;;  %1200 = vmatprep.subr.bf16.mxu0 %v1772_v56 }
  0xe8   :  { %605 = vmatmul.mubr.bf16.vlgmr.msra.gmra.mrb[0].mxu1 %v2055_v57  ;;  %v147_v63 = vpop.f32.mrb[5].mxu0 }
  0xe9   :  { %646 = vmatpush1.bf16.msra.mxu1 %v1707_v60  ;;  %v1778_v60 = vld [vmem:[%s2491_s4 + $0xe4] ss:$16 sps:$4 sm:$0xff]  }
  0xea   :  { %647 = vmatprep.subr.bf16.mxu1 %v1712_v61  ;;  %v1776_v61 = vld [vmem:[%s2491_s4 + $0xe0] ss:$16 sps:$4 sm:$0xff]  }
  0xeb   :  { %v151_v2 = vpop.f32.mrb[6].mxu0 }
  0xec   :  { %v2070_v4 = vpack.c.bf16 %v151_v2, %v145_v62  ;;  %v153_v5 = vpop.f32.mrb[7].mxu0  ;;  %v1781_v62 = vld [vmem:[%s2491_s4 + $0x104] ss:$16 sps:$4 sm:$0xff]  }
  0xed   :  { %v2072_v6 = vpack.c.bf16 %v153_v5, %v147_v63  ;;  %648 = vmatpush1.bf16.msra.mxu1 %v1710_v0  ;;  %v1779_v63 = vld [vmem:[%s2491_s4 + $0x100] ss:$16 sps:$4 sm:$0xff]   ;;  %v1784_v0 = vld [vmem:[%s2491_s4 + $0x124] ss:$16 sps:$4 sm:$0xff]  }
  0xee   :  { %649 = vmatprep.subr.bf16.mxu1 %v1715_v1  ;;  %v1782_v1 = vld [vmem:[%s2491_s4 + $0x120] ss:$16 sps:$4 sm:$0xff]   ;;  %v1787_v2 = vld [vmem:[%s2491_s4 + $0x144] ss:$16 sps:$4 sm:$0xff]  }
  0xef   :  { %614 = vmatprep.mubr.bf16.mxu1 %v2072_v6  ;;  %v157_v9 = vpop.f32.mrb[8].mxu0  ;;  %v1790_v5 = vld [vmem:[%s2491_s4 + $0x164] ss:$16 sps:$4 sm:$0xff]  }
  0xf0   :  { %615 = vmatmul.mubr.bf16.gmra.mrb[4].mxu1 %v2070_v4  ;;  %v159_v10 = vpop.f32.mrb[9].mxu0 }
  0xf1   :  { %650 = vmatpush1.bf16.msra.mxu1 %v1713_v7  ;;  %v1793_v7 = vld [vmem:[%s2491_s4 + $0x184] ss:$16 sps:$4 sm:$0xff]  }
  0xf2   :  { %651 = vmatprep.subr.bf16.mxu1 %v1718_v8  ;;  %v1791_v8 = vld [vmem:[%s2491_s4 + $0x180] ss:$16 sps:$4 sm:$0xff]  }
  0xf3   :  { %v163_v13 = vpop.f32.mrb[10].mxu0 }
  0xf4   :  { %v2088_v14 = vpack.c.bf16 %v163_v13, %v157_v9  ;;  %v165_v15 = vpop.f32.mrb[11].mxu0  ;;  %v1796_v9 = vld [vmem:[%s2491_s4 + $0x1a4] ss:$16 sps:$4 sm:$0xff]  }
  0xf5   :  { %v185_v16 = vpack.c.bf16 %v165_v15, %v159_v10  ;;  %652 = vmatpush1.bf16.msra.mxu1 %v1716_v11  ;;  %v1794_v10 = vld [vmem:[%s2491_s4 + $0x1a0] ss:$16 sps:$4 sm:$0xff]   ;;  %v1799_v11 = vld [vmem:[%s2491_s4 + $0x1c4] ss:$16 sps:$4 sm:$0xff]   ;;  %v1805_v15 = vld [vmem:[%s2491_s4 + $0xc] ss:$16 sps:$4 sm:$0xff]  }
  0xf6   :  { %653 = vmatprep.subr.bf16.mxu1 %v1721_v12  ;;  %v1797_v12 = vld [vmem:[%s2491_s4 + $0x1c0] ss:$16 sps:$4 sm:$0xff]   ;;  %v1802_v13 = vld [vmem:[%s2491_s4 + $0x1e4] ss:$16 sps:$4 sm:$0xff]  }
  0xf7   :  { %624 = vmatprep.mubr.bf16.mxu1 %v185_v16  ;;  %v169_v19 = vpop.f32.mrb[12].mxu0 }
  0xf8   :  { %625 = vmatmul.mubr.bf16.gmra.mrb[8].mxu1 %v2088_v14  ;;  %v171_v20 = vpop.f32.mrb[13].mxu0 }
  0xf9   :  { %654 = vmatpush1.bf16.msra.mxu1 %v1719_v17 }
  0xfa   :  { %655 = vmatprep.subr.bf16.mxu1 %v1724_v18 }
  0xfb   :  { %v175_v23 = vpop.f32.mrb[14].mxu0 }
  0xfc   :  { %v186_v24 = vpack.c.bf16 %v175_v23, %v169_v19  ;;  %v177_v25 = vpop.f32.mrb[15].mxu0 }
  0xfd   :  { %v187_v26 = vpack.c.bf16 %v177_v25, %v171_v20  ;;  %656 = vmatpush1.bf16.msra.mxu1 %v1722_v21 }
  0xfe   :  { %657 = vmatprep.subr.bf16.mxu1 %v1727_v22 }
  0xff   :  { %634 = vmatprep.mubr.bf16.mxu1 %v187_v26 }
 0x100   :  { %635 = vmatmul.mubr.bf16.gmra.mrb[12].mxu1 %v186_v24 }
 0x101   :  { %658 = vmatpush1.bf16.msra.mxu1 %v1725_v27  ;;  %677 = vmatprep.mubr.bf16.mxu1 %v181_v59  ;;  %v1773_v59 = vld [vmem:[%s2491_s4 + $0xc0] ss:$16 sps:$4 sm:$0xff]  }
 0x102   :  { %659 = vmatprep.subr.bf16.mxu1 %v1730_v28 }
 0x105   :  { %660 = vmatpush1.bf16.msra.mxu1 %v1728_v29 }
 0x106   :  { %661 = vmatprep.subr.bf16.mxu1 %v1733_v30 }
 0x109   :  { %662 = vmatpush1.bf16.msra.mxu1 %v1731_v31 }
 0x10a   :  { %663 = vmatprep.subr.bf16.mxu1 %v1736_v32  ;;  %v734_v32 = vld [vmem:[%s2492_s5] sm:$0xff] }
 0x10d   :  { %664 = vmatpush1.bf16.msra.mxu1 %v1734_v33  ;;  %v742_v33 = vld [vmem:[%s2493_s6] sm:$0xff] }
 0x10e   :  { %665 = vmatprep.subr.bf16.mxu1 %v1739_v34  ;;  %v743_v34 = vld [vmem:[%s2493_s6 + $0x8] sm:$0xff] }
 0x111   :  { %666 = vmatpush1.bf16.msra.mxu1 %v1737_v35  ;;  %v735_v35 = vld [vmem:[%s2492_s5 + $0x8] sm:$0xff] }
 0x112   :  { %667 = vmatprep.subr.bf16.mxu1 %v1742_v36  ;;  %v736_v36 = vld [vmem:[%s2492_s5 + $0x10] sm:$0xff] }
 0x115   :  { %668 = vmatpush1.bf16.msra.mxu1 %v1740_v37  ;;  %v744_v37 = vld [vmem:[%s2493_s6 + $0x10] sm:$0xff] }
 0x116   :  { %669 = vmatprep.subr.bf16.mxu1 %v1745_v38  ;;  %v745_v38 = vld [vmem:[%s2493_s6 + $0x18] sm:$0xff] }
 0x119   :  { %670 = vmatpush1.bf16.msra.mxu1 %v1743_v39 }
 0x11a   :  { %671 = vmatprep.subr.bf16.mxu1 %v1748_v40 }
 0x11d   :  { %672 = vmatpush1.bf16.msra.mxu1 %v1746_v41 }
 0x11e   :  { %673 = vmatprep.subr.bf16.mxu1 %v1751_v42 }
 0x121   :  { %674 = vmatpush1.bf16.msra.mxu1 %v1749_v43  ;;  %v737_v43 = vld [vmem:[%s2492_s5 + $0x18] sm:$0xff] }
 0x122   :  { %675 = vmatprep.subr.bf16.mxu1 %v1754_v44 }
 0x125   :  { %676 = vmatpush1.bf16.msra.mxu1 %v1752_v45 }
 0x128   :  { %678 = vmatmul.mubr.bf16.vlgmr.msra.gmra.mrb[8].mxu1 %v2055_v57  ;;  %v1770_v57 = vld [vmem:[%s2491_s4 + $0xa0] ss:$16 sps:$4 sm:$0xff]  }
 0x129   :  { %687 = vmatprep.mubr.bf16.mxu1 %v2072_v6  ;;  %1201 = vmatpush1.bf16.msra.mxu0 %v1770_v57  ;;  %v1788_v6 = vld [vmem:[%s2491_s4 + $0x160] ss:$16 sps:$4 sm:$0xff]  }
 0x12a   :  { %1202 = vmatprep.subr.bf16.mxu0 %v1775_v58  ;;  %v738_v57 = vld [vmem:[%s2492_s5 + $0x20] sm:$0xff] }
 0x12b   :  { %v746_v58 = vld [vmem:[%s2493_s6 + $0x20] sm:$0xff] }
 0x12d   :  { %1203 = vmatpush1.bf16.msra.mxu0 %v1773_v59 }
 0x12e   :  { %1204 = vmatprep.subr.bf16.mxu0 %v1778_v60 }
 0x130   :  { %688 = vmatmul.mubr.bf16.gmra.mrb[12].mxu1 %v2070_v4  ;;  %v1785_v4 = vld [vmem:[%s2491_s4 + $0x140] ss:$16 sps:$4 sm:$0xff]  }
 0x131   :  { %697 = vmatprep.mubr.bf16.mxu1 %v185_v16  ;;  %1205 = vmatpush1.bf16.msra.mxu0 %v1776_v61 }
 0x132   :  { %1206 = vmatprep.subr.bf16.mxu0 %v1781_v62  ;;  %v739_v62 = vld [vmem:[%s2492_s5 + $0x28] sm:$0xff] }
 0x135   :  { %1207 = vmatpush1.bf16.msra.mxu0 %v1779_v63  ;;  %v747_v63 = vld [vmem:[%s2493_s6 + $0x28] sm:$0xff] }
 0x136   :  { %1208 = vmatprep.subr.bf16.mxu0 %v1784_v0 }
 0x138   :  { %698 = vmatmul.mubr.bf16.gmra.mrb[16].mxu1 %v2088_v14  ;;  %v1800_v14 = vld [vmem:[%s2491_s4 + $0x1e0] ss:$16 sps:$4 sm:$0xff]  }
 0x139   :  { %707 = vmatprep.mubr.bf16.mxu1 %v187_v26  ;;  %1209 = vmatpush1.bf16.msra.mxu0 %v1782_v1 }
 0x13a   :  { %1210 = vmatprep.subr.bf16.mxu0 %v1787_v2 }
 0x13d   :  { %1211 = vmatpush1.bf16.msra.mxu0 %v1785_v4 }
 0x13e   :  { %1212 = vmatprep.subr.bf16.mxu0 %v1790_v5  ;;  %v748_v5 = vld [vmem:[%s2493_s6 + $0x30] sm:$0xff] }
 0x140   :  { %708 = vmatmul.mubr.bf16.gmra.mrb[20].mxu1 %v186_v24 }
 0x141   :  { %1439 = vmatprep.mubr.f32.mxu1 %v1851_v3  ;;  %1213 = vmatpush1.bf16.msra.mxu0 %v1788_v6 }
 0x142   :  { %1214 = vmatprep.subr.bf16.mxu0 %v1793_v7 }
 0x145   :  { %1215 = vmatpush1.bf16.msra.mxu0 %v1791_v8 }
 0x146   :  { %1216 = vmatprep.subr.bf16.mxu0 %v1796_v9 }
 0x149   :  { %1217 = vmatpush1.bf16.msra.mxu0 %v1794_v10 }
 0x14a   :  { %1218 = vmatprep.subr.bf16.mxu0 %v1799_v11 }
 0x14d   :  { %1219 = vmatpush1.bf16.msra.mxu0 %v1797_v12  ;;  %v740_v12 = vld [vmem:[%s2492_s5 + $0x30] sm:$0xff] }
 0x14e   :  { %1220 = vmatprep.subr.bf16.mxu0 %v1802_v13 }
 0x151   :  { %1221 = vmatpush1.bf16.msra.mxu0 %v1800_v14 }
 0x152   :  { %1263 = vmatprep.subr.bf16.mxu0 %v1805_v15 }
 0x1bb   :  { %v606_v16 = vpop.f32.mrb[0].mxu1 }
 0x1bc   :  { %v608_v17 = vpop.f32.mrb[1].mxu1 }
 0x1bd   :  { %v610_v18 = vpop.f32.mrb[2].mxu1 }
 0x1be   :  { %v612_v19 = vpop.f32.mrb[3].mxu1 }
 0x1c3   :  { %v2264_v20 = vpop.f32.mrb[4].mxu1 }
 0x1c4   :  { %v2266_v21 = vpop.f32.mrb[5].mxu1 }
 0x1c5   :  { %v2268_v22 = vpop.f32.mrb[6].mxu1 }
 0x1c6   :  { %v2270_v23 = vpop.f32.mrb[7].mxu1 }
 0x1fb   :  { %v679_v24 = vpop.f32.mrb[8].mxu1 }
 0x1fc   :  { %v681_v25 = vpop.f32.mrb[9].mxu1  ;;  %v758_v40 = vmul.f32 %v742_v33, %v679_v24  ;;  %v782_v41 = vmul.f32 %v734_v32, %v679_v24 }
 0x1fd   :  { %v683_v26 = vpop.f32.mrb[10].mxu1  ;;  %v759_v42 = vmul.f32 %v743_v34, %v681_v25  ;;  %v783_v46 = vmul.f32 %v735_v35, %v681_v25 }
 0x1fe   :  { %v685_v27 = vpop.f32.mrb[11].mxu1  ;;  %v760_v47 = vmul.f32 %v744_v37, %v683_v26  ;;  %v784_v48 = vmul.f32 %v736_v36, %v683_v26  ;;  %v741_v26 = vld [vmem:[%s2492_s5 + $0x38] sm:$0xff] }
 0x1ff   :  { %v761_v51 = vmul.f32 %v745_v38, %v685_v27  ;;  %v785_v56 = vmul.f32 %v737_v43, %v685_v27 }
 0x203   :  { %v689_v28 = vpop.f32.mrb[12].mxu1 }
 0x204   :  { %v691_v29 = vpop.f32.mrb[13].mxu1  ;;  %v762_v10 = vmul.f32 %v746_v58, %v689_v28  ;;  %v786_v11 = vmul.f32 %v738_v57, %v689_v28 }
 0x205   :  { %v693_v30 = vpop.f32.mrb[14].mxu1  ;;  %v763_v15 = vmul.f32 %v747_v63, %v691_v29 }
 0x206   :  { %v2272_v31 = vpop.f32.mrb[15].mxu1  ;;  %v764_v25 = vmul.f32 %v748_v5, %v693_v30 }
 0x20b   :  { %v699_v39 = vpop.f32.mrb[16].mxu1 }
 0x20c   :  { %v718_v44 = vsub.f32 %v606_v16, %v699_v39  ;;  %v701_v45 = vpop.f32.mrb[17].mxu1  ;;  %v787_v16 = vmul.f32 %v739_v62, %v691_v29  ;;  %v788_v29 = vmul.f32 %v740_v12, %v693_v30  ;;  %v1808_v30 = vld [vmem:[%s2491_s4 + $0x2c] ss:$16 sps:$4 sm:$0xff]  }
 0x20d   :  { %v719_v49 = vsub.f32 %v608_v17, %v701_v45  ;;  %v703_v50 = vpop.f32.mrb[18].mxu1  ;;  %v749_v17 = vld [vmem:[%s2493_s6 + $0x38] sm:$0xff] }
 0x20e   :  { %v750_v52 = vmul.f32 %v734_v32, %v718_v44  ;;  %v774_v53 = vmul.f32 %v742_v33, %v718_v44  ;;  %v720_v54 = vsub.f32 %v610_v18, %v703_v50  ;;  %v705_v55 = vpop.f32.mrb[19].mxu1  ;;  %v765_v39 = vmul.f32 %v749_v17, %v2272_v31 }
 0x20f   :  { %v751_v59 = vmul.f32 %v735_v35, %v719_v49  ;;  %v775_v60 = vmul.f32 %v743_v34, %v719_v49  ;;  %v721_v61 = vsub.f32 %v612_v19, %v705_v55 }
 0x210   :  { %v766_v0 = vsub.f32 %v750_v52, %v758_v40  ;;  %v790_v1 = vadd.f32 %v782_v41, %v774_v53  ;;  %v752_v2 = vmul.f32 %v736_v36, %v720_v54  ;;  %v776_v4 = vmul.f32 %v744_v37, %v720_v54  ;;  %v1803_v37 = vld [vmem:[%s2491_s4 + $0x8] ss:$16 sps:$4 sm:$0xff]  }
 0x211   :  { %v767_v6 = vsub.f32 %v751_v59, %v759_v42  ;;  %v791_v7 = vadd.f32 %v783_v46, %v775_v60  ;;  %v753_v8 = vmul.f32 %v737_v43, %v721_v61  ;;  %v777_v9 = vmul.f32 %v745_v38, %v721_v61  ;;  %v1809_v60 = vld [vmem:[%s2491_s4 + $0x48] ss:$16 sps:$4 sm:$0xff]  }
 0x212   :  { %v768_v13 = vsub.f32 %v752_v2, %v760_v47  ;;  %v792_v14 = vadd.f32 %v784_v48, %v776_v4  ;;  %v1820_v2 = vld [vmem:[%s2491_s4 + $0xac] ss:$16 sps:$4 sm:$0xff]   ;;  %v1818_v4 = vld [vmem:[%s2491_s4 + $0xa8] ss:$16 sps:$4 sm:$0xff]  }
 0x213   :  { %v769_v18 = vsub.f32 %v753_v8, %v761_v51  ;;  %v793_v19 = vadd.f32 %v785_v56, %v777_v9  ;;  %v709_v24 = vpop.f32.mrb[20].mxu1  ;;  %v1824_v8 = vld [vmem:[%s2491_s4 + $0xe8] ss:$16 sps:$4 sm:$0xff]   ;;  %v1829_v9 = vld [vmem:[%s2491_s4 + $0x10c] ss:$16 sps:$4 sm:$0xff]  }
 0x214   :  { %v2322_v27 = vpack.c.bf16 %v768_v13, %v766_v0  ;;  %v722_v28 = vsub.f32 %v2264_v20, %v709_v24  ;;  %v711_v32 = vpop.f32.mrb[21].mxu1  ;;  %v2325_v33 = vpack.c.bf16 %v792_v14, %v790_v1  ;;  %v1817_v0 = vld [vmem:[%s2491_s4 + $0x8c] ss:$16 sps:$4 sm:$0xff]   ;;  %v1815_v1 = vld [vmem:[%s2491_s4 + $0x88] ss:$16 sps:$4 sm:$0xff]  }
 0x215   :  { %v723_v34 = vsub.f32 %v2266_v21, %v711_v32  ;;  %v713_v35 = vpop.f32.mrb[22].mxu1  ;;  %v799_v36 = vpack.c.bf16 %v769_v18, %v767_v6  ;;  %v2331_v38 = vpack.c.bf16 %v793_v19, %v791_v7  ;;  %v789_v21 = vmul.f32 %v741_v26, %v2272_v31  ;;  %v1806_v31 = vld [vmem:[%s2491_s4 + $0x28] ss:$16 sps:$4 sm:$0xff]   ;;  %v1826_v7 = vld [vmem:[%s2491_s4 + $0xec] ss:$16 sps:$4 sm:$0xff]  }
 0x216   :  { %v754_v40 = vmul.f32 %v738_v57, %v722_v28  ;;  %v778_v41 = vmul.f32 %v746_v58, %v722_v28  ;;  %v724_v20 = vsub.f32 %v2268_v22, %v713_v35  ;;  %v715_v42 = vpop.f32.mrb[23].mxu1  ;;  %v1821_v6 = vld [vmem:[%s2491_s4 + $0xc8] ss:$16 sps:$4 sm:$0xff]   ;;  %v1835_v13 = vld [vmem:[%s2491_s4 + $0x14c] ss:$16 sps:$4 sm:$0xff]  }
 0x217   :  { %v755_v43 = vmul.f32 %v739_v62, %v723_v34  ;;  %v779_v44 = vmul.f32 %v747_v63, %v723_v34  ;;  %v725_v45 = vsub.f32 %v2270_v23, %v715_v42  ;;  %1222 = vmatprep.mubr.bf16.mxu0 %v799_v36  ;;  %v1811_v23 = vld [vmem:[%s2491_s4 + $0x4c] ss:$16 sps:$4 sm:$0xff]   ;;  %v1812_v63 = vld [vmem:[%s2491_s4 + $0x68] ss:$16 sps:$4 sm:$0xff]  }
 0x218   :  { %v770_v46 = vsub.f32 %v754_v40, %v762_v10  ;;  %v794_v47 = vadd.f32 %v786_v11, %v778_v41  ;;  %v756_v48 = vmul.f32 %v740_v12, %v724_v20  ;;  %v780_v49 = vmul.f32 %v748_v5, %v724_v20  ;;  %1223 = vmatmul.mubr.bf16.vlgmr.msra.gmra.mrb[16].mxu0 %v2322_v27  ;;  %v1814_v62 = vld [vmem:[%s2491_s4 + $0x6c] ss:$16 sps:$4 sm:$0xff]   ;;  %v1827_v10 = vld [vmem:[%s2491_s4 + $0x108] ss:$16 sps:$4 sm:$0xff]  }
 0x219   :  { %v771_v50 = vsub.f32 %v755_v43, %v763_v15  ;;  %v795_v22 = vadd.f32 %v787_v16, %v779_v44  ;;  %v757_v51 = vmul.f32 %v741_v26, %v725_v45  ;;  %v781_v52 = vmul.f32 %v749_v17, %v725_v45  ;;  %1264 = vmatpush1.bf16.msra.mxu0 %v1803_v37  ;;  %v1823_v5 = vld [vmem:[%s2491_s4 + $0xcc] ss:$16 sps:$4 sm:$0xff]   ;;  %v1830_v12 = vld [vmem:[%s2491_s4 + $0x128] ss:$16 sps:$4 sm:$0xff]  }
 0x21a   :  { %v772_v53 = vsub.f32 %v756_v48, %v764_v25  ;;  %v796_v54 = vadd.f32 %v788_v29, %v780_v49  ;;  %1265 = vmatprep.subr.bf16.mxu0 %v1808_v30  ;;  %v1832_v11 = vld [vmem:[%s2491_s4 + $0x12c] ss:$16 sps:$4 sm:$0xff]   ;;  %v1833_v14 = vld [vmem:[%s2491_s4 + $0x148] ss:$16 sps:$4 sm:$0xff]  }
 0x21b   :  { %v773_v55 = vsub.f32 %v757_v51, %v765_v39  ;;  %v797_v56 = vadd.f32 %v789_v21, %v781_v52  ;;  %v1838_v15 = vld [vmem:[%s2491_s4 + $0x16c] ss:$16 sps:$4 sm:$0xff]   ;;  %v1836_v16 = vld [vmem:[%s2491_s4 + $0x168] ss:$16 sps:$4 sm:$0xff]  }
 0x21c   :  { %v2347_v57 = vpack.c.bf16 %v772_v53, %v770_v46  ;;  %v2349_v58 = vpack.c.bf16 %v796_v54, %v794_v47  ;;  %v1841_v17 = vld [vmem:[%s2491_s4 + $0x18c] ss:$16 sps:$4 sm:$0xff]   ;;  %v1839_v18 = vld [vmem:[%s2491_s4 + $0x188] ss:$16 sps:$4 sm:$0xff]  }
 0x21d   :  { %1266 = vmatpush1.bf16.msra.mxu0 %v1806_v31  ;;  %v2351_v59 = vpack.c.bf16 %v773_v55, %v771_v50  ;;  %v2356_v61 = vpack.c.bf16 %v797_v56, %v795_v22  ;;  %v1844_v19 = vld [vmem:[%s2491_s4 + $0x1ac] ss:$16 sps:$4 sm:$0xff]   ;;  %v1842_v24 = vld [vmem:[%s2491_s4 + $0x1a8] ss:$16 sps:$4 sm:$0xff]  }
 0x21e   :  { %1267 = vmatprep.subr.bf16.mxu0 %v1811_v23  ;;  %v1847_v25 = vld [vmem:[%s2491_s4 + $0x1cc] ss:$16 sps:$4 sm:$0xff]   ;;  %v1845_v26 = vld [vmem:[%s2491_s4 + $0x1c8] ss:$16 sps:$4 sm:$0xff]  }
 0x21f   :  { %1232 = vmatprep.mubr.bf16.mxu0 %v2351_v59  ;;  %v1850_v28 = vld [vmem:[%s2491_s4 + $0x1ec] ss:$16 sps:$4 sm:$0xff]   ;;  %v1848_v32 = vld [vmem:[%s2491_s4 + $0x1e8] ss:$16 sps:$4 sm:$0xff]  }
 0x220   :  { %1233 = vmatmul.mubr.bf16.gmra.mrb[20].mxu0 %v2347_v57 }
 0x221   :  { %1268 = vmatpush1.bf16.msra.mxu0 %v1809_v60  ;;  %1242 = vmatprep.mubr.bf16.mxu0 %v2331_v38 }
 0x222   :  { %1269 = vmatprep.subr.bf16.mxu0 %v1814_v62 }
 0x225   :  { %1270 = vmatpush1.bf16.msra.mxu0 %v1812_v63 }
 0x226   :  { %1271 = vmatprep.subr.bf16.mxu0 %v1817_v0 }
 0x228   :  { %1243 = vmatmul.mubr.bf16.gmra.mrb[24].mxu0 %v2325_v33 }
 0x229   :  { %1272 = vmatpush1.bf16.msra.mxu0 %v1815_v1  ;;  %1252 = vmatprep.mubr.bf16.mxu0 %v2356_v61  ;;  %v1353_v1 = vld [vmem:[%s2494_s2 + $0x8] sm:$0xff] }
 0x22a   :  { %1273 = vmatprep.subr.bf16.mxu0 %v1820_v2  ;;  %v1352_v2 = vld [vmem:[%s2494_s2] sm:$0xff] }
 0x22d   :  { %1274 = vmatpush1.bf16.msra.mxu0 %v1818_v4  ;;  %v1354_v4 = vld [vmem:[%s2494_s2 + $0x10] sm:$0xff] }
 0x22e   :  { %1275 = vmatprep.subr.bf16.mxu0 %v1823_v5  ;;  %v1355_v5 = vld [vmem:[%s2494_s2 + $0x18] sm:$0xff] }
 0x230   :  { %1253 = vmatmul.mubr.bf16.gmra.mrb[28].mxu0 %v2349_v58 }
 0x231   :  { %1276 = vmatpush1.bf16.msra.mxu0 %v1821_v6  ;;  %1295 = vmatprep.mubr.bf16.mxu0 %v799_v36 }
 0x232   :  { %1277 = vmatprep.subr.bf16.mxu0 %v1826_v7 }
 0x235   :  { %1278 = vmatpush1.bf16.msra.mxu0 %v1824_v8 }
 0x236   :  { %1279 = vmatprep.subr.bf16.mxu0 %v1829_v9 }
 0x239   :  { %1280 = vmatpush1.bf16.msra.mxu0 %v1827_v10 }
 0x23a   :  { %1281 = vmatprep.subr.bf16.mxu0 %v1832_v11 }
 0x23d   :  { %1282 = vmatpush1.bf16.msra.mxu0 %v1830_v12 }
 0x23e   :  { %1283 = vmatprep.subr.bf16.mxu0 %v1835_v13 }
 0x241   :  { %1284 = vmatpush1.bf16.msra.mxu0 %v1833_v14 }
 0x242   :  { %1285 = vmatprep.subr.bf16.mxu0 %v1838_v15 }
 0x245   :  { %1286 = vmatpush1.bf16.msra.mxu0 %v1836_v16 }
 0x246   :  { %1287 = vmatprep.subr.bf16.mxu0 %v1841_v17 }
 0x249   :  { %1288 = vmatpush1.bf16.msra.mxu0 %v1839_v18 }
 0x24a   :  { %1289 = vmatprep.subr.bf16.mxu0 %v1844_v19 }
 0x24d   :  { %1290 = vmatpush1.bf16.msra.mxu0 %v1842_v24 }
 0x24e   :  { %1291 = vmatprep.subr.bf16.mxu0 %v1847_v25 }
 0x251   :  { %1292 = vmatpush1.bf16.msra.mxu0 %v1845_v26 }
 0x252   :  { %1293 = vmatprep.subr.bf16.mxu0 %v1850_v28 }
 0x255   :  { %1294 = vmatpush1.bf16.msra.mxu0 %v1848_v32 }
 0x258   :  { %1296 = vmatmul.mubr.bf16.vlgmr.msra.gmra.mrb[24].mxu0 %v2322_v27 }
 0x259   :  { %1305 = vmatprep.mubr.bf16.mxu0 %v2351_v59 }
 0x260   :  { %1306 = vmatmul.mubr.bf16.gmra.mrb[28].mxu0 %v2347_v57 }
 0x261   :  { %1315 = vmatprep.mubr.bf16.mxu0 %v2331_v38 }
 0x268   :  { %1316 = vmatmul.mubr.bf16.gmra.mrb[32].mxu0 %v2325_v33 }
 0x269   :  { %1325 = vmatprep.mubr.bf16.mxu0 %v2356_v61 }
 0x270   :  { %1326 = vmatmul.mubr.bf16.gmra.mrb[36].mxu0 %v2349_v58 }
 0x271   :  { %1433 = vmatprep.mubr.f32.mxu0 %v1851_v3 }
 0x2eb   :  { %v1224_v29 = vpop.f32.mrb[16].mxu0 }
 0x2ec   :  { %v1226_v34 = vpop.f32.mrb[17].mxu0 }
 0x2ed   :  { %v1228_v35 = vpop.f32.mrb[18].mxu0 }
 0x2ee   :  { %v1230_v36 = vpop.f32.mrb[19].mxu0 }
 0x2f3   :  { %v1234_v37 = vpop.f32.mrb[20].mxu0 }
 0x2f4   :  { %v1236_v27 = vpop.f32.mrb[21].mxu0 }
 0x2f5   :  { %v1238_v39 = vpop.f32.mrb[22].mxu0 }
 0x2f6   :  { %v1240_v40 = vpop.f32.mrb[23].mxu0 }
 0x32b   :  { %v1297_v41 = vpop.f32.mrb[24].mxu0 }
 0x32c   :  { %v1299_v20 = vpop.f32.mrb[25].mxu0 }
 0x32d   :  { %v1301_v42 = vpop.f32.mrb[26].mxu0 }
 0x32e   :  { %v1628_v38 = vpack.c.bf16 %v1301_v42, %v1297_v41  ;;  %v1303_v30 = vpop.f32.mrb[27].mxu0 }
 0x32f   :  { %v1626_v33 = vpack.c.bf16 %v1303_v30, %v1299_v20 }
 0x333   :  { %v1307_v21 = vpop.f32.mrb[28].mxu0 }
 0x334   :  { %v1309_v43 = vpop.f32.mrb[29].mxu0 }
 0x335   :  { %v1311_v44 = vpop.f32.mrb[30].mxu0 }
 0x336   :  { %v1632_v45 = vpack.c.bf16 %v1311_v44, %v1307_v21  ;;  %v1313_v46 = vpop.f32.mrb[31].mxu0 }
 0x337   :  { %v1630_v47 = vpack.c.bf16 %v1313_v46, %v1309_v43 }
 0x33b   :  { %v1317_v48 = vpop.f32.mrb[32].mxu0 }
 0x33c   :  { %v1336_v49 = vsub.f32 %v1224_v29, %v1317_v48  ;;  %v1319_v50 = vpop.f32.mrb[33].mxu0 }
 0x33d   :  { %v1337_v22 = vsub.f32 %v1226_v34, %v1319_v50  ;;  %v1321_v51 = vpop.f32.mrb[34].mxu0 }
 0x33e   :  { %v1338_v52 = vsub.f32 %v1228_v35, %v1321_v51  ;;  %v1323_v31 = vpop.f32.mrb[35].mxu0 }
 0x33f   :  { %v1339_v53 = vsub.f32 %v1230_v36, %v1323_v31 }
 0x340   :  { %v1620_v54 = vpack.c.bf16 %v1338_v52, %v1336_v49 }
 0x341   :  { %v1618_v23 = vpack.c.bf16 %v1339_v53, %v1337_v22 }
 0x343   :  { %v1327_v55 = vpop.f32.mrb[36].mxu0  ;;  %1619 = vmatprep.subr.bf16.mxu0 %v1618_v23  ;;  %1634 = vmatprep.subr.bf16.mxu1 %v1618_v23 }
 0x344   :  { %v1340_v56 = vsub.f32 %v1234_v37, %v1327_v55  ;;  %v1329_v57 = vpop.f32.mrb[37].mxu0  ;;  %1621 = vmatpush1.bf16.msra.mxu0 %v1620_v54  ;;  %1638 = vmatpush1.bf16.msra.mxu1 %v1620_v54 }
 0x345   :  { %v1341_v58 = vsub.f32 %v1236_v27, %v1329_v57  ;;  %v1331_v59 = vpop.f32.mrb[38].mxu0 }
 0x346   :  { %v1342_v60 = vsub.f32 %v1238_v39, %v1331_v59  ;;  %v1333_v61 = vpop.f32.mrb[39].mxu0 }
 0x347   :  { %v1343_v62 = vsub.f32 %v1240_v40, %v1333_v61 }
 0x348   :  { %v1624_v63 = vpack.c.bf16 %v1342_v60, %v1340_v56 }
 0x349   :  { %v1622_v0 = vpack.c.bf16 %v1343_v62, %v1341_v58 }
 0x34b   :  { %1623 = vmatprep.subr.bf16.mxu0 %v1622_v0  ;;  %1635 = vmatprep.subr.bf16.mxu1 %v1622_v0 }
 0x34c   :  { %1625 = vmatpush1.bf16.msra.mxu0 %v1624_v63  ;;  %1639 = vmatpush1.bf16.msra.mxu1 %v1624_v63 }
 0x34d   :  { %1627 = vmatprep.subr.bf16.mxu0 %v1626_v33  ;;  %1636 = vmatprep.subr.bf16.mxu1 %v1626_v33 }
 0x350   :  { %1629 = vmatpush1.bf16.msra.mxu0 %v1628_v38  ;;  %1640 = vmatpush1.bf16.msra.mxu1 %v1628_v38 }
 0x351   :  { %1631 = vmatprep.subr.bf16.mxu0 %v1630_v47  ;;  %1637 = vmatprep.subr.bf16.mxu1 %v1630_v47 }
 0x354   :  { %1633 = vmatpush1.bf16.msra.mxu0 %v1632_v45  ;;  %1641 = vmatpush1.bf16.msra.mxu1 %v1632_v45 }
 0x357   :  { %1607 = vmatmul.mubr.msk.f32.vlgmr.msra.gmra.mrb[24].mxu1 %vm1356_vm1, %v1353_v1  ;;  %1606 = vmatmul.mubr.msk.f32.vlgmr.msra.gmra.mrb[40].mxu0 %vm1356_vm1, %v1352_v2 }
 0x358   :  { %1445 = vmatprep.mubr.f32.mxu1 %v1851_v3 }
 0x35b   :  { %1608 = vmatmul.mubr.msk.f32.gmra.mrb[26].mxu1 %vm1356_vm1, %v1354_v4 }
 0x35c   :  { %1451 = vmatprep.mubr.f32.mxu1 %v1851_v3 }
 0x35f   :  { %1609 = vmatmul.mubr.msk.f32.gmra.mrb[28].mxu1 %vm1356_vm1, %v1355_v5 }
 0x42a   :  { %v1441_v6 = vpop.f32.mrb[24].mxu1  ;;  %v1435_v7 = vpop.f32.mrb[40].mxu0 }
 0x42b   :  { %1460 = vst [vmem:[%s2495_s7 + $0x10] sm:$0xff] %v1441_v6  ;;  %v1443_v8 = vpop.f32.mrb[25].mxu1  ;;  %1458 = vst [vmem:[%s2495_s7] sm:$0xff] %v1435_v7  ;;  %v1437_v9 = vpop.f32.mrb[41].mxu0 }
 0x42c   :  { %1461 = vst [vmem:[%s2495_s7 + $0x18] sm:$0xff] %v1443_v8  ;;  %1459 = vst [vmem:[%s2495_s7 + $0x8] sm:$0xff] %v1437_v9 }
 0x42e   :  { %v1447_v3 = vpop.f32.mrb[26].mxu1 }
 0x42f   :  { %1462 = vst [vmem:[%s2495_s7 + $0x20] sm:$0xff] %v1447_v3  ;;  %v1449_v10 = vpop.f32.mrb[27].mxu1 }
 0x430   :  { %1463 = vst [vmem:[%s2495_s7 + $0x28] sm:$0xff] %v1449_v10 }
 0x432   :  { %v1453_v11 = vpop.f32.mrb[28].mxu1 }
 0x433   :  { %1464 = vst [vmem:[%s2495_s7 + $0x30] sm:$0xff] %v1453_v11  ;;  %v1455_v12 = vpop.f32.mrb[29].mxu1 }
 0x434   :  { %1465 = vst [vmem:[%s2495_s7 + $0x38] sm:$0xff] %v1455_v12 }

</bundles_post_ra>
